<compile_context>
chip_gen: v6e
topology: v6e:2x2x1
jax: 0.10.0
libtpu: 0.0.40
codegen_flags: <defaults>
</compile_context>

<pallas_src>
import jax
import jax.numpy as jnp
from jax.experimental import pallas as pl
from jax.experimental.pallas import tpu as pltpu


# ------------------------------ primary: no-op -------------------------------

def _identity_noop_kernel(x_ref, o_ref):
    # Output buffer is aliased to the input buffer, so the data is already in
    # place.  touch() records a fake read+write dependency so the (otherwise
    # empty) kernel has a producer for the aliased output; no DMA, no vld/vst.
    del x_ref
    pltpu.touch(o_ref)


def _identity_noop(x):
    return pl.pallas_call(
        _identity_noop_kernel,
        out_shape=jax.ShapeDtypeStruct(x.shape, x.dtype),
        in_specs=[pl.BlockSpec(memory_space=pl.ANY)],
        out_specs=pl.BlockSpec(memory_space=pl.ANY),
        input_output_aliases={0: 0},
        cost_estimate=pl.CostEstimate(flops=0, transcendentals=0, bytes_accessed=0),
    )(x)


# ---------------------------- fallback: tuned copy ---------------------------

def _identity_copy_kernel(x_ref, o_ref):
    o_ref[...] = x_ref[...]


_MAX_COLS = 8192  # lane-dense cap on column width (multiple of 128)


def _pick_cols(n_total, shape):
    """Largest multiple-of-128 divisor of n_total (capped), else a safe fallback."""
    best = 0
    c = 128
    while c <= min(n_total, _MAX_COLS):
        if n_total % c == 0:
            best = c
        c += 128
    if best:
        return best
    # No multiple-of-128 divisor: fall back to the original last dim (masked
    # stores; correct, just not lane-dense). Full-extent blocks are always legal.
    if len(shape) >= 2 and shape[-1] > 0:
        return shape[-1]
    return n_total


def _vmem_budget():
    """(scoped VMEM limit, target tile bytes), gated per TPU generation."""
    try:
        phys = pltpu.get_tpu_info().vmem_capacity_bytes
    except Exception:
        phys = 128 * 1024 * 1024
    if phys <= 64 * 1024 * 1024:
        # v7x: only 64 MiB VMEM per TensorCore — leave headroom for compiler scratch.
        return 48 * 1024 * 1024, 8 * 1024 * 1024
    # v5e / v6e: 128 MiB physical VMEM.
    return 64 * 1024 * 1024, 8 * 1024 * 1024


def _identity_copy(x):
    orig_shape = x.shape
    n_total = int(x.size)
    itemsize = jnp.dtype(x.dtype).itemsize
    vmem_limit, tile_bytes = _vmem_budget()

    # Lane-dense 2-D view: (R, C) with C a multiple of 128 whenever possible.
    C = _pick_cols(n_total, orig_shape)
    R = n_total // C
    x2 = x.reshape(R, C)

    # Full-width (lane-dense) column blocks unless a single row alone already
    # exceeds the tile budget (only possible on pathological fallback shapes).
    tc = C if C * itemsize <= tile_bytes else _MAX_COLS

    # Row tile: full extent for small arrays, otherwise a multiple of 32
    # sublanes (layout-clean for f32/bf16/int8) sized so one tile is ~8 MiB.
    if R <= 32:
        tr = R
    else:
        rows = max(32, ((tile_bytes // (tc * itemsize)) // 32) * 32)
        tr = R if rows >= R else rows

    grid = (pl.cdiv(R, tr), pl.cdiv(C, tc))

    out2 = pl.pallas_call(
        _identity_copy_kernel,
        out_shape=jax.ShapeDtypeStruct((R, C), x.dtype),
        grid=grid,
        in_specs=[pl.BlockSpec((tr, tc), lambda i, j: (i, j))],
        out_specs=pl.BlockSpec((tr, tc), lambda i, j: (i, j)),
        # No input/output aliasing here: if the caller keeps using x (normal
        # identity usage), XLA would insert a defensive copy and negate it.
        cost_estimate=pl.CostEstimate(
            flops=0, transcendentals=0, bytes_accessed=2 * n_total * itemsize),
        compiler_params=pltpu.CompilerParams(
            dimension_semantics=("parallel", "parallel"),
            vmem_limit_bytes=vmem_limit,
        ),
    )(x2)
    return out2.reshape(orig_shape)


# ---------------------------------- wrapper ----------------------------------

def identity_pallas(x):
    """Pallas identity: returns a 1-tuple (x,) matching the torch module."""
    if x.size == 0:
        return (x,)
    try:
        y = _identity_noop(x)
        jax.block_until_ready(y)
        return (y,)
    except Exception:
        # TODO(synk): ANY-space no-op path rejected on this backend; fall back
        # to the tuned memory-bound copy (still bit-exact).
        return (_identity_copy(x),)


if __name__ == "__main__":
    key = jax.random.PRNGKey(0)

    # Primary test: small NCHW-style input (2, 4, 16, 16).
    x = jax.random.normal(key, (2, 4, 16, 16), dtype=jnp.float32)
    (y,) = identity_pallas(x)
    jax.block_until_ready(y)
    assert y.shape == x.shape, (y.shape, x.shape)
    assert y.dtype == x.dtype, (y.dtype, x.dtype)
    assert bool(jnp.all(y == x)), "identity mismatch"

    # Secondary test: odd shape with no multiple-of-128 divisor.
    x2 = jax.random.normal(jax.random.PRNGKey(0), (5, 7, 9), dtype=jnp.float32)
    (y2,) = identity_pallas(x2)
    jax.block_until_ready(y2)
    assert y2.shape == x2.shape and y2.dtype == x2.dtype
    assert bool(jnp.all(y2 == x2)), "identity mismatch (odd shape)"

    print("KERNEL_OK")
</pallas_src>

<mosaic_0001>
module attributes {stable_mosaic.version = 11 : i64} {
  func.func @_identity_noop_kernel(%arg0: memref<2x4x16x16xf32, #tpu.memory_space<any>>, %arg1: memref<2x4x16x16xf32, #tpu.memory_space<any>>) attributes {dimension_semantics = [], scalar_prefetch = 0 : i64, scratch_operands = 0 : i64, tpu.core_type = #tpu.core_type<tc>} {
    return
  }
}

module attributes {stable_mosaic.version = 11 : i64} {
  func.func @_identity_copy_kernel(%arg0: i32, %arg1: i32, %arg2: memref<1x2048xf32, #tpu.memory_space<vmem>>, %arg3: memref<1x2048xf32, #tpu.memory_space<vmem>>) attributes {dimension_semantics = [#tpu.dimension_semantics<parallel>, #tpu.dimension_semantics<parallel>], iteration_bounds = array<i64: 1, 1>, scalar_prefetch = 0 : i64, scratch_operands = 0 : i64, tpu.core_type = #tpu.core_type<tc>, window_params = [{transform_indices = @transform_0, window_bounds = array<i64: 1, 2048>}, {transform_indices = @transform_1, window_bounds = array<i64: 1, 2048>}]} {
    %c0 = arith.constant 0 : index
    %c0_0 = arith.constant 0 : index
    %0 = vector.load %arg2[%c0, %c0_0] : memref<1x2048xf32, #tpu.memory_space<vmem>>, vector<1x2048xf32>
    %c0_1 = arith.constant 0 : index
    %c0_2 = arith.constant 0 : index
    %1 = vector.load %arg3[%c0_1, %c0_2] : memref<1x2048xf32, #tpu.memory_space<vmem>>, vector<1x2048xf32>
    tpu.vector_store %arg3[%c0_1, %c0_2], %0 {strides = array<i32>} : memref<1x2048xf32, #tpu.memory_space<vmem>>, vector<1x2048xf32>,
    return
  }
  func.func @transform_0(%arg0: i32, %arg1: i32) -> (i32, i32) {
    %c0_i32 = arith.constant 0 : i32
    return %arg0, %arg1 : i32, i32
  }
  func.func @transform_1(%arg0: i32, %arg1: i32) -> (i32, i32) {
    %c0_i32 = arith.constant 0 : i32
    return %arg0, %arg1 : i32, i32
  }
}

</mosaic_0001>

<bundles_post_ra>
// kernel: tpu_custom_call.1
= control target key start
LH: loop header
LB: loop body
LE: loop exit
PB: predicated region body
PF: predicated region fallthrough
CT: control target
= control target key end

     0   :  { %s16_s0 = inlined_call_operand.hbm [shape: f32[2,4,16,16], index: 0, kind: input, shape index: {}, may-alias: {0,1}]   ;;  %s17_s1 = inlined_call_operand.hbm [shape: f32[2,4,16,16], index: 1, kind: output, shape index: {}, may-alias: {0,1}]  }

// kernel: tpu_custom_call.1
= control target key start
LH: loop header
LB: loop body
LE: loop exit
PB: predicated region body
PF: predicated region fallthrough
CT: control target
= control target key end

     0   :  { %6 = vsyncpa [#allocation3], 0  ;;  %s104_s0 = inlined_call_operand.hbm [shape: f32[1,2048], index: 0, kind: input, shape index: {}]   ;;  %s105_s1 = inlined_call_operand.hbm [shape: f32[1,2048], index: 1, kind: output, shape index: {}]  }
   0x1   :  { %7 = vsyncpa [#allocation4], 0  ;;  %s86_s6 = smov [#allocation2]  }
   0x2   :  { %s14_s7 = sshll.u32 %s86_s6, 4  ;;  %s15_s7 = int_to_ptr.vmem [resolvable:$true] %s14_s7 }
   0x3   :  { %s50_s8 = scalar_lea.vmem %s15_s7, 256  ;;  %p55_p1 = scmp.lt.s32.totalorder %s15_s7, %s15_s7 }
   0x4   :  { %p51_p0 = scmp.ne.s32.totalorder %s15_s7, %s50_s8  ;;  %p56_p2 = scmp.lt.s32.totalorder %s50_s8, %s50_s8 }
   0x6   :  { %p57_p3 = por %p56_p2, %p55_p1 }
   0x8   :  { %p58_p4 = pnand %p57_p3, %p51_p0 }
   0xa   :  { %61 = shalt.err (!%p58_p4)
}
   0xb   :  { %17 = dma.hbm_to_vmem [thread:$0]  %s104_s0, 256, %s15_s7, [#allocation3]  }
   0xc   :  { %82 = dma.done.wait [#allocation3], 256  }
   0xd   :  { %83 = vsyncadd [#allocation3], 4294967040  ;;  %s87_s11 = smov [#allocation5]   ;;  %v21_v0 = vld [vmem:[#allocation2] sm:$0xff]  ;;  %v22_v1 = vld [vmem:[#allocation2 + $0x8] sm:$0xff] }
   0xe   :  { %s31_s12 = sshll.u32 %s87_s11, 4  ;;  %23 = vst [vmem:[#allocation5] sm:$0xff] %v21_v0  ;;  %24 = vst [vmem:[#allocation5 + $0x8] sm:$0xff] %v22_v1  ;;  %s32_s12 = int_to_ptr.vmem [resolvable:$true] %s31_s12 }
   0xf   :  { %s62_s13 = scalar_lea.vmem %s32_s12, 256  ;;  %p67_p6 = scmp.lt.s32.totalorder %s32_s12, %s32_s12 }
  0x10   :  { %p63_p5 = scmp.ne.s32.totalorder %s32_s12, %s62_s13  ;;  %p68_p7 = scmp.lt.s32.totalorder %s62_s13, %s62_s13 }
  0x12   :  { %p69_p8 = por %p68_p7, %p67_p6 }
  0x14   :  { %p70_p9 = pnand %p69_p8, %p63_p5 }
  0x16   :  { %73 = shalt.err (!%p70_p9)
}
  0x17   :  { %34 = dma.vmem_to_hbm [thread:$0]  %s32_s12, 256, %s105_s1, [#allocation4]  }
  0x18   :  { %84 = dma.done.wait [#allocation4], 256  }
  0x19   :  { %85 = vsyncadd [#allocation4], 4294967040 }
  0x1a   :  { %38 = vsyncpa [#allocation3], 1 }
  0x1b   :  { %39 = vsyncpa [#allocation4], 1 }

</bundles_post_ra>
